<compile_context>
chip_gen: v7x
topology: tpu7x:2x2x1
jax: 0.10.0
libtpu: 0.0.40
codegen_flags: <defaults>
</compile_context>

<pallas_src>
import jax
import jax.numpy as jnp
from jax.experimental import pallas as pl
from jax.experimental.pallas import tpu as pltpu


def _round_up(n: int, m: int) -> int:
    return ((n + m - 1) // m) * m


def mlp_kernel(x_ref, w1_ref, b1_ref, w2_ref, b2_ref, o_ref):
    # fc1 on the MXU (bf16 operands, f32 accumulation); bias + ReLU on the VPU.
    h = jnp.dot(x_ref[...].astype(jnp.bfloat16), w1_ref[...],
                preferred_element_type=jnp.float32)
    h = jnp.maximum(h + b1_ref[...], 0.0)
    # TODO(synk): dropout is identity in eval/inference mode (PyTorch semantics);
    #             training-mode dropout would draw a mask via pltpu.prng_seed/prng_random_bits.
    # fc2 as a second MXU pass: the real weights live in column 0 of the (H, 128) bf16
    # matrix, so the reduction over H happens on the (idle) MXU instead of the XLU.
    z = jnp.dot(h.astype(jnp.bfloat16), w2_ref[...],
                preferred_element_type=jnp.float32)[:, :1]
    z = z + b2_ref[0, 0]
    # sigmoid: exp on the EUP, approx reciprocal also on the EUP.
    # NOTE: approx=True can return values a hair above 1.0 for large z (~1e-3 error).
    o_ref[...] = (pl.reciprocal(1.0 + jnp.exp(-z), approx=True)).astype(o_ref.dtype)


def prepare_mlp_params(w1_t, b1, w2_row, b2):
    """One-time weight prep, hoisted out of the per-call path.

    w1_t:   (I, H)  fc1 weight, already transposed (torch fc1.weight.T)
    b1:     (H,)    fc1 bias
    w2_row: (1, H) or (H,)  fc2 weight row (torch fc2.weight)
    b2:     scalar / (1,)   fc2 bias
    """
    I, H = w1_t.shape
    w1_bf = jnp.asarray(w1_t, jnp.float32).astype(jnp.bfloat16)          # (I, H) bf16
    b1_row = jnp.asarray(b1, jnp.float32).reshape(1, H)                  # (1, H) f32
    w2_col0 = jnp.zeros((H, 128), jnp.float32).at[:, 0].set(
        jnp.asarray(w2_row, jnp.float32).reshape(H))
    w2_bf = w2_col0.astype(jnp.bfloat16)                                 # (H, 128) bf16
    b2_s = jnp.asarray(b2, jnp.float32).reshape(1, 1)                    # (1, 1) f32, SMEM
    return w1_bf, b1_row, w2_bf, b2_s


def mlp_forward(x, params, *, block_b=2048):
    """Fused MLP forward.  x: (B, I) float; params from prepare_mlp_params(). Returns (B, 1) f32.

    On v7x pick block_b small enough that cdiv(B, TM) >= 2 (ideally >= 4-8) so the
    "parallel" batch axis actually feeds both TensorCores.
    """
    w1_bf, b1_row, w2_bf, b2_s = params
    B, I = x.shape
    H = w1_bf.shape[1]

    # Batch tile: multiple of 8 sublanes, as large as reasonable (VMEM cost is tiny).
    TM = max(8, min(_round_up(block_b, 8), _round_up(B, 8)))
    grid = (pl.cdiv(B, TM),)

    out = pl.pallas_call(
        mlp_kernel,
        out_shape=jax.ShapeDtypeStruct((B, 1), jnp.float32),
        grid_spec=pltpu.PrefetchScalarGridSpec(
            num_scalar_prefetch=0,
            grid=grid,
            in_specs=[
                pl.BlockSpec((TM, I), lambda i: (i, 0)),    # x: batch-streamed, full last dim
                pl.BlockSpec((I, H), lambda i: (0, 0)),     # W1 (bf16): resident
                pl.BlockSpec((1, H), lambda i: (0, 0)),     # b1: resident
                pl.BlockSpec((H, 128), lambda i: (0, 0)),   # w2 column matrix (bf16): resident
                pl.BlockSpec(memory_space=pltpu.MemorySpace.SMEM),  # b2 scalar in SMEM
            ],
            out_specs=pl.BlockSpec((TM, 1), lambda i: (i, 0)),
        ),
        compiler_params=pltpu.CompilerParams(
            dimension_semantics=("parallel",),  # shard batch tiles across TCs on v7x
        ),
    )(x.astype(jnp.float32), w1_bf, b1_row, w2_bf, b2_s)

    return out


def _reference(x, w1_t, b1, w2_row, b2):
    h = jnp.maximum(x @ w1_t + b1.reshape(1, -1), 0.0)
    z = h @ w2_row.reshape(1, -1).T + jnp.asarray(b2).reshape(1, 1)
    return jax.nn.sigmoid(z)


if __name__ == "__main__":
    # Small shapes consistent with the module: batch=8, input_dim=32, hidden_dim=32.
    B, I, H = 8, 32, 32

    key = jax.random.PRNGKey(0)
    kx, kw1, kb1, kw2, kb2, kx2 = jax.random.split(key, 6)

    # PyTorch-Linear-like uniform init: U(-1/sqrt(fan_in), 1/sqrt(fan_in)).
    bound1 = 1.0 / jnp.sqrt(jnp.float32(I))
    bound2 = 1.0 / jnp.sqrt(jnp.float32(H))

    x = jax.random.normal(kx, (B, I), dtype=jnp.float32)
    w1_t = jax.random.uniform(kw1, (I, H), minval=-bound1, maxval=bound1, dtype=jnp.float32)
    b1 = jax.random.uniform(kb1, (H,), minval=-bound1, maxval=bound1, dtype=jnp.float32)
    w2_row = jax.random.uniform(kw2, (1, H), minval=-bound2, maxval=bound2, dtype=jnp.float32)
    b2 = jax.random.uniform(kb2, (1,), minval=-bound2, maxval=bound2, dtype=jnp.float32)

    params = prepare_mlp_params(w1_t, b1, w2_row, b2)

    # Single-tile case (B=8 -> grid=(1,)).
    out = jax.block_until_ready(mlp_forward(x, params))
    ref = _reference(x, w1_t, b1, w2_row, b2)
    assert out.shape == (B, 1)
    assert jnp.allclose(out, ref, atol=5e-3, rtol=5e-3)

    # Multi-tile case with a non-divisible batch (100 rows, 32-row tiles -> 4 tiles,
    # last one partially out of bounds) to exercise the cdiv grid + boundary masking.
    B2 = 100
    x2 = jax.random.normal(kx2, (B2, I), dtype=jnp.float32)
    out2 = jax.block_until_ready(mlp_forward(x2, params, block_b=32))
    ref2 = _reference(x2, w1_t, b1, w2_row, b2)
    assert out2.shape == (B2, 1)
    assert jnp.allclose(out2, ref2, atol=5e-3, rtol=5e-3)

    print("KERNEL_OK")
</pallas_src>

<mosaic_0001>
module attributes {stable_mosaic.version = 11 : i64} {
  func.func @mlp_kernel(%arg0: i32, %arg1: memref<8x32xf32, #tpu.memory_space<vmem>>, %arg2: memref<32x32xbf16, #tpu.memory_space<vmem>>, %arg3: memref<1x32xf32, #tpu.memory_space<vmem>>, %arg4: memref<32x128xbf16, #tpu.memory_space<vmem>>, %arg5: memref<1x1xf32, #tpu.memory_space<smem>>, %arg6: memref<8x1xf32, #tpu.memory_space<vmem>>) attributes {dimension_semantics = [#tpu.dimension_semantics<parallel>], iteration_bounds = array<i64: 1>, scalar_prefetch = 0 : i64, scratch_operands = 0 : i64, tpu.core_type = #tpu.core_type<tc>, window_params = [{transform_indices = @transform_0, window_bounds = array<i64: 8, 32>}, {pipeline_mode = #tpu.pipeline_mode<synchronous>, transform_indices = @transform_1, window_bounds = array<i64: 32, 32>}, {pipeline_mode = #tpu.pipeline_mode<synchronous>, transform_indices = @transform_2, window_bounds = array<i64: 1, 32>}, {pipeline_mode = #tpu.pipeline_mode<synchronous>, transform_indices = @transform_3, window_bounds = array<i64: 32, 128>}, {transform_indices = @transform_4, window_bounds = array<i64: 1, 1>}, {transform_indices = @transform_5, window_bounds = array<i64: 8, 1>}]} {
    %c0 = arith.constant 0 : index
    %c0_0 = arith.constant 0 : index
    %0 = vector.load %arg1[%c0, %c0_0] : memref<8x32xf32, #tpu.memory_space<vmem>>, vector<8x32xf32>
    %1 = arith.truncf %0 : vector<8x32xf32> to vector<8x32xbf16>
    %c0_1 = arith.constant 0 : index
    %c0_2 = arith.constant 0 : index
    %2 = vector.load %arg2[%c0_1, %c0_2] : memref<32x32xbf16, #tpu.memory_space<vmem>>, vector<32x32xbf16>
    %cst = arith.constant dense<0.000000e+00> : vector<8x32xf32>
    %3 = tpu.matmul %1, %2, %cst {dimension_numbers = #tpu.dot_dimension_numbers<[1], [0], [0], [1], [0, 0, 1, 1], [], []>} : vector<8x32xbf16>, vector<32x32xbf16>, vector<8x32xf32> -> vector<8x32xf32>
    %c0_3 = arith.constant 0 : index
    %c0_4 = arith.constant 0 : index
    %4 = vector.load %arg3[%c0_3, %c0_4] : memref<1x32xf32, #tpu.memory_space<vmem>>, vector<1x32xf32>
    %5 = vector.broadcast %4 : vector<1x32xf32> to vector<8x32xf32>
    %6 = arith.addf %3, %5 : vector<8x32xf32>
    %cst_5 = arith.constant 0.000000e+00 : f32
    %7 = vector.broadcast %cst_5 : f32 to vector<8x32xf32>
    %8 = arith.maximumf %6, %7 : vector<8x32xf32>
    %9 = arith.truncf %8 : vector<8x32xf32> to vector<8x32xbf16>
    %c0_6 = arith.constant 0 : index
    %c0_7 = arith.constant 0 : index
    %10 = vector.load %arg4[%c0_6, %c0_7] : memref<32x128xbf16, #tpu.memory_space<vmem>>, vector<32x128xbf16>
    %cst_8 = arith.constant dense<0.000000e+00> : vector<8x128xf32>
    %11 = tpu.matmul %9, %10, %cst_8 {dimension_numbers = #tpu.dot_dimension_numbers<[1], [0], [0], [1], [0, 0, 1, 1], [], []>} : vector<8x32xbf16>, vector<32x128xbf16>, vector<8x128xf32> -> vector<8x128xf32>
    %12 = vector.extract_strided_slice %11 {offsets = [0, 0], sizes = [8, 1], strides = [1, 1]} : vector<8x128xf32> to vector<8x1xf32>
    %c0_9 = arith.constant 0 : index
    %c0_10 = arith.constant 0 : index
    %13 = memref.load %arg5[%c0_9, %c0_10] : memref<1x1xf32, #tpu.memory_space<smem>>
    %14 = vector.broadcast %13 : f32 to vector<8x1xf32>
    %15 = arith.addf %12, %14 : vector<8x1xf32>
    %cst_11 = arith.constant 0.000000e+00 : f32
    %16 = vector.broadcast %cst_11 : f32 to vector<8x1xf32>
    %17 = arith.subf %16, %15 : vector<8x1xf32>
    %18 = math.exp %17 : vector<8x1xf32>
    %cst_12 = arith.constant 1.000000e+00 : f32
    %19 = vector.broadcast %cst_12 : f32 to vector<8x1xf32>
    %20 = arith.addf %19, %18 : vector<8x1xf32>
    %21 = tpu.reciprocal %20 {approx = true} : vector<8x1xf32> -> vector<8x1xf32>
    %c0_13 = arith.constant 0 : index
    %c0_14 = arith.constant 0 : index
    %22 = vector.load %arg6[%c0_13, %c0_14] : memref<8x1xf32, #tpu.memory_space<vmem>>, vector<8x1xf32>
    tpu.vector_store %arg6[%c0_13, %c0_14], %21 {strides = array<i32>} : memref<8x1xf32, #tpu.memory_space<vmem>>, vector<8x1xf32>,
    return
  }
  func.func @transform_0(%arg0: i32) -> (i32, i32) {
    %c0_i32 = arith.constant 0 : i32
    %c0_i32_0 = arith.constant 0 : i32
    return %arg0, %c0_i32 : i32, i32
  }
  func.func @transform_1(%arg0: i32) -> (i32, i32) {
    %c0_i32 = arith.constant 0 : i32
    %c0_i32_0 = arith.constant 0 : i32
    %c0_i32_1 = arith.constant 0 : i32
    return %c0_i32, %c0_i32_0 : i32, i32
  }
  func.func @transform_2(%arg0: i32) -> (i32, i32) {
    %c0_i32 = arith.constant 0 : i32
    %c0_i32_0 = arith.constant 0 : i32
    %c0_i32_1 = arith.constant 0 : i32
    return %c0_i32, %c0_i32_0 : i32, i32
  }
  func.func @transform_3(%arg0: i32) -> (i32, i32) {
    %c0_i32 = arith.constant 0 : i32
    %c0_i32_0 = arith.constant 0 : i32
    %c0_i32_1 = arith.constant 0 : i32
    return %c0_i32, %c0_i32_0 : i32, i32
  }
  func.func @transform_4(%arg0: i32) -> (i32, i32) {
    %c0_i32 = arith.constant 0 : i32
    %c0_i32_0 = arith.constant 0 : i32
    %c0_i32_1 = arith.constant 0 : i32
    return %c0_i32, %c0_i32_0 : i32, i32
  }
  func.func @transform_5(%arg0: i32) -> (i32, i32) {
    %c0_i32 = arith.constant 0 : i32
    %c0_i32_0 = arith.constant 0 : i32
    return %arg0, %c0_i32 : i32, i32
  }
}

</mosaic_0001>

<bundles_post_ra>
// kernel: tpu_custom_call.1
= control target key start
LH: loop header
LB: loop body
LE: loop exit
PB: predicated region body
PF: predicated region fallthrough
CT: control target
= control target key end

     0   :  { %11 = vsyncpa [#allocation4], 0  ;;  %s409_s0 = inlined_call_operand.hbm [shape: f32[8,32], index: 0, kind: input, shape index: {}]   ;;  %s410_s1 = inlined_call_operand.hbm [shape: bf16[32,32], index: 1, kind: input, shape index: {}]   ;;  %s411_s2 = inlined_call_operand.vmem [shape: f32[1,32], index: 2, kind: input, shape index: {}]   ;;  %s412_s3 = inlined_call_operand.hbm [shape: bf16[32,128], index: 3, kind: input, shape index: {}]   ;;  %s413_s4 = inlined_call_operand.<no memory space> [shape: f32[1,1], index: 4, kind: input, shape index: {}]   ;;  %s414_s5 = inlined_call_operand.vmem [shape: f32[8,1], index: 5, kind: output, shape index: {}]  }
   0x1   :  { %12 = vsyncpa [#allocation6], 0  ;;  %s321_s18 = smov [#allocation5]   ;;  %s251_s22 = scalar_lea.hbm %s410_s1, 256 }
   0x2   :  { %s28_s19 = sshll.u32 %s321_s18, 4  ;;  %p252_p0 = scmp.ne.s32.totalorder %s410_s1, %s251_s22  ;;  %s29_s19 = int_to_ptr.vmem [resolvable:$true] %s28_s19 }
   0x3   :  { %p255_p1 = scmp.lt.u32.totalorder %s251_s22, %s410_s1 }
   0x5   :  { %p257_p2 = pnand %p255_p1, %p252_p0 }
   0x7   :  { %260 = shalt.err (!%p257_p2)
}
   0x8   :  { %s261_s27 = scalar_lea.vmem %s29_s19, 256  ;;  %p266_p4 = scmp.lt.s32.totalorder %s29_s19, %s29_s19 }
   0x9   :  { %p262_p3 = scmp.ne.s32.totalorder %s29_s19, %s261_s27  ;;  %p267_p5 = scmp.lt.s32.totalorder %s261_s27, %s261_s27 }
   0xb   :  { %p268_p6 = por %p267_p5, %p266_p4 }
   0xd   :  { %p269_p7 = pnand %p268_p6, %p262_p3 }
   0xf   :  { %272 = shalt.err (!%p269_p7)
}
  0x10   :  { %s322_s28 = smov 64   ;;  %s323_s29 = smov 4  }
  0x11   :  { %34 = dma.hbm_to_vmem [thread:$0]  %s410_s1, 256, %s29_s19, [#allocation6], %s322_s28, %s322_s28, %s323_s29  }
  0x12   :  { %s324_s7 = smov [#allocation3]   ;;  %s325_s9 = smov [#allocation7]  }
  0x13   :  { %s19_s8 = sshll.u32 %s324_s7, 4  ;;  %s42_s10 = sshll.u32 %s325_s9, 4  ;;  %s20_s8 = int_to_ptr.vmem [resolvable:$true] %s19_s8  ;;  %s43_s10 = int_to_ptr.vmem [resolvable:$true] %s42_s10 }
  0x14   :  { %s273_s13 = scalar_lea.hbm %s409_s0, 128 }
  0x15   :  { %p274_p8 = scmp.ne.s32.totalorder %s409_s0, %s273_s13  ;;  %p277_p9 = scmp.lt.u32.totalorder %s273_s13, %s409_s0 }
  0x17   :  { %p279_p10 = pnand %p277_p9, %p274_p8 }
  0x19   :  { %282 = shalt.err (!%p279_p10)
}
  0x1a   :  { %s283_s1 = scalar_lea.vmem %s20_s8, 128  ;;  %p288_p12 = scmp.lt.s32.totalorder %s20_s8, %s20_s8 }
  0x1b   :  { %p284_p11 = scmp.ne.s32.totalorder %s20_s8, %s283_s1  ;;  %p289_p13 = scmp.lt.s32.totalorder %s283_s1, %s283_s1 }
  0x1d   :  { %p290_p0 = por %p289_p13, %p288_p12 }
  0x1f   :  { %p291_p1 = pnand %p290_p0, %p284_p11 }
  0x21   :  { %294 = shalt.err (!%p291_p1)
}
  0x22   :  { %22 = dma.hbm_to_vmem [thread:$0]  %s409_s0, 128, %s20_s8, [#allocation4]  }
  0x23   :  { %s295_s22 = scalar_lea.hbm %s412_s3, 256 }
  0x24   :  { %p296_p2 = scmp.ne.s32.totalorder %s412_s3, %s295_s22  ;;  %p299_p3 = scmp.lt.u32.totalorder %s295_s22, %s412_s3 }
  0x26   :  { %p301_p4 = pnand %p299_p3, %p296_p2 }
  0x28   :  { %304 = shalt.err (!%p301_p4)
}
  0x29   :  { %s305_s27 = scalar_lea.vmem %s43_s10, 256  ;;  %p310_p6 = scmp.lt.s32.totalorder %s43_s10, %s43_s10 }
  0x2a   :  { %p306_p5 = scmp.ne.s32.totalorder %s43_s10, %s305_s27  ;;  %p311_p7 = scmp.lt.s32.totalorder %s305_s27, %s305_s27 }
  0x2c   :  { %p312_p8 = por %p311_p7, %p310_p6 }
  0x2e   :  { %p313_p9 = pnand %p312_p8, %p306_p5 }
  0x30   :  { %316 = shalt.err (!%p313_p9)
}
  0x31   :  { %48 = dma.hbm_to_vmem [thread:$0]  %s412_s3, 256, %s43_s10, [#allocation6], %s322_s28, %s322_s28, %s323_s29  }
  0x32   :  { %317 = dma.done.wait [#allocation4], 128  }
  0x33   :  { %318 = vsyncadd [#allocation4], 4294967168 }
  0x34   :  { %319 = dma.done.wait [#allocation6], 512  }
  0x35   :  { %320 = vsyncadd [#allocation6], 4294966784  ;;  %v326_v0 = vmov 0.0   ;;  %vm327_vm0 = vmmov 0   ;;  %v243_v1 = vld [vmem:[#allocation5] sm:$0xff]   ;;  %v244_v2 = vld [vmem:[#allocation5 + $0x8] sm:$0xff]   ;;  %v192_v15 = vstv %s413_s4 }
  0x36   :  { %220 = vmatprep.subr.bf16.mxu0 %v326_v0  ;;  %224 = vmatprep.mubr.msk.bf16.mxu0 %vm327_vm0, %v326_v0  ;;  %v61_v3 = vld [vmem:[#allocation3] sm:$0xff]  ;;  %vm86_vm1 = vcmask 261120   ;;  %v245_v5 = vld [vmem:[#allocation7] sm:$0xff]   ;;  %vm199_vm2 = vcmask 7168  }
  0x37   :  { %228 = vmatprep.subr.bf16.mxu1 %v326_v0  ;;  %232 = vmatprep.mubr.msk.bf16.mxu1 %vm327_vm0, %v326_v0  ;;  %v62_v4 = vpack.c.bf16 %v61_v3, %v61_v3  ;;  %v246_v6 = vld [vmem:[#allocation7 + $0x8] sm:$0xff]  }
  0x38   :  { %221 = vmatpush3.bf16.msra.mxu0 %v243_v1  ;;  %229 = vmatpush3.bf16.msra.mxu1 %v245_v5  ;;  %v207_v7 = vld [vmem:[%s411_s2] ss:$0 sm:$0xff] }
  0x39   :  { %222 = vmatprep.subr.bf16.mxu0 %v326_v0  ;;  %230 = vmatprep.subr.bf16.mxu1 %v326_v0 }
  0x3c   :  { %223 = vmatpush3.bf16.msra.mxu0 %v244_v2  ;;  %231 = vmatpush3.bf16.msra.mxu1 %v246_v6 }
  0x3f   :  { %225 = vmatmul.mubr.msk.bf16.vlgmr.msra.gmra.mrb[0].mxu0 %vm86_vm1, %v62_v4 }
 0x112   :  { %v124_v8 = vpop.f32.mrb[0].mxu0 }
 0x113   :  { %v125_v9 = vadd.f32 %v207_v7, %v124_v8  ;;  %v226_v10 = vpop.f32.mrb[1].mxu0 }
 0x114   :  { %v127_v11 = vpop.f32.mrb[2].mxu0 }
 0x115   :  { %v130_v12 = vmax.f32 %v125_v9, 0.0  ;;  %v227_v13 = vpop.f32.mrb[3].mxu0 }
 0x117   :  { %v131_v14 = vpack.c.bf16 %v130_v12, %v130_v12 }
 0x119   :  { %233 = vmatmul.mubr.msk.bf16.vlgmr.msra.gmra.mrb[0].mxu1 %vm86_vm1, %v131_v14 }
 0x1ec   :  { %v185_v16 = vpop.f32.mrb[0].mxu1 }
 0x1ed   :  { %v193_v17 = vadd.f32 %v192_v15, %v185_v16  ;;  %v234_v18 = vpop.f32.mrb[1].mxu1 }
 0x1ee   :  { %v188_v19 = vpop.f32.mrb[2].mxu1 }
 0x1ef   :  { %v194_v20 = vsub.f32 0.0, %v193_v17  ;;  %v235_v21 = vpop.f32.mrb[3].mxu1 }
 0x1f1   :  { %v195_v22 = vmul.f32 1.442695, %v194_v20 }
 0x1f3   :  { %247 = vpow2.f32 %v195_v22 }
 0x1fd   :  { %v248_v23 = vpop.eup %247 }
 0x1fe   :  { %v197_v24 = vadd.f32 1.0, %v248_v23 }
 0x200   :  { %249 = vrcp.f32 %v197_v24 }
 0x20a   :  { %v250_v25 = vpop.eup %249 }
 0x20b   :  { %200 = vst.msk [vmem:[%s414_s5] sm:$0xff] %vm199_vm2, %v250_v25 }
 0x20c   :  { %205 = vsyncpa [#allocation4], 1 }
 0x20d   :  { %206 = vsyncpa [#allocation6], 1 }

</bundles_post_ra>
